<compile_context>
chip_gen: v7x
topology: tpu7x:2x2x1
jax: 0.10.0
libtpu: 0.0.40
codegen_flags: <defaults>
</compile_context>

<pallas_src>
import jax
import jax.numpy as jnp
from jax.experimental import pallas as pl
from jax.experimental.pallas import tpu as pltpu


def _mlp_kernel(x_ref, w1_ref, b1_ref, w2_ref, b2_ref, o_ref):
    x = x_ref[...]                                                      # (TM, Din) bf16
    h = jnp.dot(x, w1_ref[...], preferred_element_type=jnp.float32)    # (TM, Hp)  f32
    h = jnp.tanh(h + b1_ref[...])                                       # f32 bias/tanh (VPU/EUP)
    y = jnp.dot(h.astype(jnp.bfloat16), w2_ref[...],                    # bf16 MXU operands
                preferred_element_type=jnp.float32)                     # (TM, Dp)  f32
    o_ref[...] = (y + b2_ref[...]).astype(o_ref.dtype)


def _round_up(a, b):
    return -(-a // b) * b


def _vmem_bytes(tm, din, hid_p, dout_p):
    """Rough per-core VMEM budget for the chosen row tile."""
    weights = (din * hid_p + hid_p * dout_p) * 2        # bf16 weights, single-buffered
    biases = (hid_p + dout_p) * 4                       # f32 biases
    x_io = 2 * tm * din * 2                             # bf16 x tile, double-buffered
    o_io = 2 * tm * dout_p * 4                          # out tile, double-buffered
    h_live = tm * hid_p * (4 + 2)                       # f32 hidden + bf16 copy
    return weights + biases + x_io + o_io + h_live


def mlp_forward(x, w1, b1, w2, b2, *, tile_rows=512, min_grid_steps=8,
                vmem_budget_bytes=32 * 1024 * 1024):
    """Fused MLP forward.

    x : (..., input_dim)            (any float dtype; used at bf16 on the MXU)
    w1: (hidden, input_dim)         PyTorch nn.Linear weight layout
    b1: (hidden,)
    w2: (output_dim, hidden)
    b2: (output_dim,)
    """
    din = x.shape[-1]
    hid = w1.shape[0]
    dout = w2.shape[0]
    lead = x.shape[:-1]
    out_dtype = x.dtype

    # Lane-dense hidden / output dims (multiples of 128). din stays native:
    # padding K only wastes x-side DMA bytes, it does not save MXU passes.
    hid_p = _round_up(hid, 128)
    dout_p = _round_up(dout, 128)

    x2d = x.reshape(-1, din).astype(jnp.bfloat16)       # no f32 upcast of activations
    n = x2d.shape[0]

    # Row tile: aim for >= min_grid_steps grid steps (>= 4 per v7x TensorCore),
    # cap at tile_rows, keep sublane-aligned (multiple of 8), respect VMEM budget.
    tm = max(8, _round_up(-(-n // min_grid_steps), 8))
    tm = min(tm, tile_rows, _round_up(n, 8))
    while tm > 8 and _vmem_bytes(tm, din, hid_p, dout_p) > vmem_budget_bytes:
        tm = max(8, _round_up(tm // 2, 8))

    n_pad = _round_up(n, tm)
    if n_pad != n:
        # Padded rows produce garbage values but are sliced off below.
        x2d = jnp.pad(x2d, ((0, n_pad - n), (0, 0)))

    # Pre-transposed, zero-padded, bf16 weights; f32 biases.
    w1t = jnp.pad(w1.T.astype(jnp.bfloat16), ((0, 0), (0, hid_p - hid)))          # (din,  hid_p)
    w2t = jnp.pad(w2.T.astype(jnp.bfloat16), ((0, hid_p - hid), (0, dout_p - dout)))  # (hid_p, dout_p)
    b1r = jnp.pad(b1.astype(jnp.float32), (0, hid_p - hid)).reshape(1, hid_p)
    b2r = jnp.pad(b2.astype(jnp.float32), (0, dout_p - dout)).reshape(1, dout_p)

    needed = _vmem_bytes(tm, din, hid_p, dout_p)
    vmem_limit = int(min(48 * 1024 * 1024, max(2 * needed, 32 * 1024 * 1024)))

    resident = pl.Buffered(1)   # constant blocks: one VMEM copy, DMA'd once

    out = pl.pallas_call(
        _mlp_kernel,
        out_shape=jax.ShapeDtypeStruct((n_pad, dout_p), out_dtype),
        grid_spec=pltpu.PrefetchScalarGridSpec(
            num_scalar_prefetch=0,
            grid=(n_pad // tm,),
            in_specs=[
                pl.BlockSpec((tm, din), lambda i: (i, 0)),                               # x tile
                pl.BlockSpec((din, hid_p), lambda i: (0, 0), pipeline_mode=resident),    # W1^T
                pl.BlockSpec((1, hid_p), lambda i: (0, 0), pipeline_mode=resident),      # b1
                pl.BlockSpec((hid_p, dout_p), lambda i: (0, 0), pipeline_mode=resident), # W2^T
                pl.BlockSpec((1, dout_p), lambda i: (0, 0), pipeline_mode=resident),     # b2
            ],
            out_specs=pl.BlockSpec((tm, dout_p), lambda i: (i, 0)),
        ),
        compiler_params=pltpu.CompilerParams(
            dimension_semantics=("parallel",),
            vmem_limit_bytes=vmem_limit,
        ),
    )(x2d, w1t, b1r, w2t, b2r)

    return out[:n, :dout].reshape(*lead, dout)


def mlp_reference(x, w1, b1, w2, b2):
    h = jnp.tanh(
        jnp.einsum("...i,hi->...h", x, w1, precision=jax.lax.Precision.HIGHEST) + b1)
    return jnp.einsum("...h,oh->...o", h, w2,
                      precision=jax.lax.Precision.HIGHEST) + b2


if __name__ == "__main__":
    input_dim, hidden_size, output_dim = 32, 64, 32
    batch, seq = 2, 256                        # 512 rows -> 8 grid steps of 64 rows

    key = jax.random.PRNGKey(0)
    kx, kw1, kb1, kw2, kb2 = jax.random.split(key, 5)

    x = jax.random.normal(kx, (batch, seq, input_dim), jnp.float32)
    w1 = jax.random.normal(kw1, (hidden_size, input_dim), jnp.float32) / (input_dim ** 0.5)
    b1 = jax.random.normal(kb1, (hidden_size,), jnp.float32) * 0.1
    w2 = jax.random.normal(kw2, (output_dim, hidden_size), jnp.float32) / (hidden_size ** 0.5)
    b2 = jax.random.normal(kb2, (output_dim,), jnp.float32) * 0.1

    out = mlp_forward(x, w1, b1, w2, b2)
    jax.block_until_ready(out)

    ref = mlp_reference(x, w1, b1, w2, b2)

    assert out.shape == (batch, seq, output_dim)
    # bf16 MXU operands with f32 accumulation: no longer bitwise comparable to
    # the HIGHEST-precision f32 reference; observed error is well inside 2e-2.
    assert jnp.allclose(out, ref, atol=2e-2, rtol=2e-2), float(jnp.max(jnp.abs(out - ref)))
    print("KERNEL_OK")
</pallas_src>

<mosaic_0001>
module attributes {stable_mosaic.version = 11 : i64} {
  func.func @_mlp_kernel(%arg0: i32, %arg1: memref<64x32xbf16, #tpu.memory_space<vmem>>, %arg2: memref<32x128xbf16, #tpu.memory_space<vmem>>, %arg3: memref<1x128xf32, #tpu.memory_space<vmem>>, %arg4: memref<128x128xbf16, #tpu.memory_space<vmem>>, %arg5: memref<1x128xf32, #tpu.memory_space<vmem>>, %arg6: memref<64x128xf32, #tpu.memory_space<vmem>>) attributes {dimension_semantics = [#tpu.dimension_semantics<parallel>], iteration_bounds = array<i64: 8>, scalar_prefetch = 0 : i64, scratch_operands = 0 : i64, tpu.core_type = #tpu.core_type<tc>, window_params = [{transform_indices = @transform_0, window_bounds = array<i64: 64, 32>}, {pipeline_mode = #tpu.pipeline_mode<synchronous>, transform_indices = @transform_1, window_bounds = array<i64: 32, 128>}, {pipeline_mode = #tpu.pipeline_mode<synchronous>, transform_indices = @transform_2, window_bounds = array<i64: 1, 128>}, {pipeline_mode = #tpu.pipeline_mode<synchronous>, transform_indices = @transform_3, window_bounds = array<i64: 128, 128>}, {pipeline_mode = #tpu.pipeline_mode<synchronous>, transform_indices = @transform_4, window_bounds = array<i64: 1, 128>}, {transform_indices = @transform_5, window_bounds = array<i64: 64, 128>}]} {
    %c0 = arith.constant 0 : index
    %c0_0 = arith.constant 0 : index
    %0 = vector.load %arg1[%c0, %c0_0] : memref<64x32xbf16, #tpu.memory_space<vmem>>, vector<64x32xbf16>
    %c0_1 = arith.constant 0 : index
    %c0_2 = arith.constant 0 : index
    %1 = vector.load %arg2[%c0_1, %c0_2] : memref<32x128xbf16, #tpu.memory_space<vmem>>, vector<32x128xbf16>
    %cst = arith.constant dense<0.000000e+00> : vector<64x128xf32>
    %2 = tpu.matmul %0, %1, %cst {dimension_numbers = #tpu.dot_dimension_numbers<[1], [0], [0], [1], [0, 0, 1, 1], [], []>} : vector<64x32xbf16>, vector<32x128xbf16>, vector<64x128xf32> -> vector<64x128xf32>
    %c0_3 = arith.constant 0 : index
    %c0_4 = arith.constant 0 : index
    %3 = vector.load %arg3[%c0_3, %c0_4] : memref<1x128xf32, #tpu.memory_space<vmem>>, vector<1x128xf32>
    %4 = vector.broadcast %3 : vector<1x128xf32> to vector<64x128xf32>
    %5 = arith.addf %2, %4 : vector<64x128xf32>
    %6 = math.tanh %5 : vector<64x128xf32>
    %7 = arith.truncf %6 : vector<64x128xf32> to vector<64x128xbf16>
    %c0_5 = arith.constant 0 : index
    %c0_6 = arith.constant 0 : index
    %8 = vector.load %arg4[%c0_5, %c0_6] : memref<128x128xbf16, #tpu.memory_space<vmem>>, vector<128x128xbf16>
    %cst_7 = arith.constant dense<0.000000e+00> : vector<64x128xf32>
    %9 = tpu.matmul %7, %8, %cst_7 {dimension_numbers = #tpu.dot_dimension_numbers<[1], [0], [0], [1], [0, 0, 1, 1], [], []>} : vector<64x128xbf16>, vector<128x128xbf16>, vector<64x128xf32> -> vector<64x128xf32>
    %c0_8 = arith.constant 0 : index
    %c0_9 = arith.constant 0 : index
    %10 = vector.load %arg5[%c0_8, %c0_9] : memref<1x128xf32, #tpu.memory_space<vmem>>, vector<1x128xf32>
    %11 = vector.broadcast %10 : vector<1x128xf32> to vector<64x128xf32>
    %12 = arith.addf %9, %11 : vector<64x128xf32>
    %c0_10 = arith.constant 0 : index
    %c0_11 = arith.constant 0 : index
    %13 = vector.load %arg6[%c0_10, %c0_11] : memref<64x128xf32, #tpu.memory_space<vmem>>, vector<64x128xf32>
    tpu.vector_store %arg6[%c0_10, %c0_11], %12 {strides = array<i32>} : memref<64x128xf32, #tpu.memory_space<vmem>>, vector<64x128xf32>,
    return
  }
  func.func @transform_0(%arg0: i32) -> (i32, i32) {
    %c0_i32 = arith.constant 0 : i32
    %c0_i32_0 = arith.constant 0 : i32
    return %arg0, %c0_i32 : i32, i32
  }
  func.func @transform_1(%arg0: i32) -> (i32, i32) {
    %c0_i32 = arith.constant 0 : i32
    %c0_i32_0 = arith.constant 0 : i32
    %c0_i32_1 = arith.constant 0 : i32
    return %c0_i32, %c0_i32_0 : i32, i32
  }
  func.func @transform_2(%arg0: i32) -> (i32, i32) {
    %c0_i32 = arith.constant 0 : i32
    %c0_i32_0 = arith.constant 0 : i32
    %c0_i32_1 = arith.constant 0 : i32
    return %c0_i32, %c0_i32_0 : i32, i32
  }
  func.func @transform_3(%arg0: i32) -> (i32, i32) {
    %c0_i32 = arith.constant 0 : i32
    %c0_i32_0 = arith.constant 0 : i32
    %c0_i32_1 = arith.constant 0 : i32
    return %c0_i32, %c0_i32_0 : i32, i32
  }
  func.func @transform_4(%arg0: i32) -> (i32, i32) {
    %c0_i32 = arith.constant 0 : i32
    %c0_i32_0 = arith.constant 0 : i32
    %c0_i32_1 = arith.constant 0 : i32
    return %c0_i32, %c0_i32_0 : i32, i32
  }
  func.func @transform_5(%arg0: i32) -> (i32, i32) {
    %c0_i32 = arith.constant 0 : i32
    %c0_i32_0 = arith.constant 0 : i32
    return %arg0, %c0_i32 : i32, i32
  }
}

</mosaic_0001>

<bundles_post_ra>
// kernel: tpu_custom_call.1
= control target key start
LH: loop header
LB: loop body
LE: loop exit
PB: predicated region body
PF: predicated region fallthrough
CT: control target
= control target key end

     0   :  { %10 = vsyncpa [#allocation3], 0  ;;  %s989_s0 = inlined_call_operand.vmem [shape: bf16[512,32], index: 0, kind: input, shape index: {}]   ;;  %s990_s1 = inlined_call_operand.vmem [shape: bf16[32,128], index: 1, kind: input, shape index: {}]   ;;  %s991_s2 = inlined_call_operand.vmem [shape: f32[1,128], index: 2, kind: input, shape index: {}]   ;;  %s992_s3 = inlined_call_operand.vmem [shape: bf16[128,128], index: 3, kind: input, shape index: {}]   ;;  %s993_s4 = inlined_call_operand.vmem [shape: f32[1,128], index: 4, kind: input, shape index: {}]   ;;  %s994_s5 = inlined_call_operand.hbm [shape: f32[512,128], index: 5, kind: output, shape index: {}]  }
   0x1   :  { %12 = vsyncpa [#allocation3 + $0x1], 0  ;;  %s843_s18 = smov 0   ;;  %s845_s19 = smov 0  }
   0x2   :  { %s847_s20 = smov 0   ;;  %s849_s21 = smov 0  }
   0x3 LB: > { %s864_s22 = sadd.s32 4294967295, %s808_s21   ;;  %s588_s23 = sadd.s32 4294967294, %s808_s21   ;;  %s808_s21 = sphi %s849_s21, %s1000_s21   ;;  %s804_s20 = sphi %s847_s20, %s999_s20   ;;  %s800_s19 = sphi %s845_s19, %s998_s19   ;;  %s796_s18 = sphi %s843_s18, %s997_s18  }
   0x4   : > { %s868_s24 = sadd.s32 1, %s808_s21   ;;  %s135_s25 = sadd.s32 1, %s804_s20 }
   0x5   : > { %s132_s26 = ssub.s32 %s808_s21, %s868_s24  ;;  %p145_p0 = scmp.ne.s32.totalorder %s804_s20, %s800_s19 }
   0x6   : > { %p133_p1 = scmp.eq.s32.totalorder %s132_s26, 0  ;;  %p146_p2 = scmp.eq.s32.totalorder %s864_s22, 7 }
   0x7   : > { %p151_p3 = scmp.ne.s32.totalorder %s800_s19, %s796_s18  ;;  %p152_p4 = scmp.eq.s32.totalorder %s588_s23, 7 }
   0x8   : > { %s879_s27 = scalar_select %p133_p1, %s804_s20, %s135_s25  }
   0x9   : > { %p881_p5 = por %p146_p2, %p145_p0  ;;  %p885_p6 = por %p152_p4, %p151_p3 }
   0xa   : > { %p591_p7 = scmp.ge.s32.totalorder %s808_s21, 1  ;;  %p191_p8 = scmp.lt.s32.totalorder %s808_s21, 9 }
   0xc   : > { %p192_p9 = pnand %p591_p7, %p191_p8 }
   0xd   : > { %v716_v0 = vld [vmem:[%s990_s1] sm:$0xff] (!%p192_p9)   ;;  %s593_s7 = sshll.u32 (!%p192_p9), %s864_s22, 3  ;;  %v717_v1 = vld [vmem:[%s990_s1 + $0x8] sm:$0xff] (!%p192_p9)   ;;  %vm278_vm0 = vcmask (!%p192_p9), 261120   ;;  %v724_v4 = vld [vmem:[%s992_s3 + $0x10] sm:$0xff] (!%p192_p9)   ;;  %s216_s16 = sand.u32 (!%p192_p9), 1, %s800_s19  }
   0xe   : > { %195 = sbr.rel (%p192_p9) target bundleno = 497 (0x1f1), region = 40  ;;  %p220_p10 = scmp.lt.s32.totalorder (!%p192_p9), %s593_s7, 63  ;;  %639 = vmatprep.subr.bf16.mxu0 (!%p192_p9), %v716_v0  ;;  %v722_v2 = vld [vmem:[%s992_s3] sm:$0xff] (!%p192_p9)   ;;  %v723_v3 = vld [vmem:[%s992_s3 + $0x8] sm:$0xff] (!%p192_p9)   ;;  %v725_v9 = vld [vmem:[%s992_s3 + $0x18] sm:$0xff] (!%p192_p9)  }
   0xf   : > { %640 = vmatpush3.bf16.msra.mxu0 (!%p192_p9), %v716_v0  ;;  %651 = vmatprep.subr.bf16.mxu1 (!%p192_p9), %v722_v2  ;;  %v726_v10 = vld [vmem:[%s992_s3 + $0x20] sm:$0xff] (!%p192_p9)   ;;  %v727_v11 = vld [vmem:[%s992_s3 + $0x28] sm:$0xff] (!%p192_p9)   ;;  %v728_v12 = vld [vmem:[%s992_s3 + $0x30] sm:$0xff] (!%p192_p9)   ;;  %s592_s17 = sshll.u32 (!%p192_p9), %s216_s16, 6  ;;  %s620_s30 = sshll.u32 (!%p192_p9), %s864_s22, 10 }
  0x10   : > { %641 = vmatprep.subr.bf16.mxu0 (!%p192_p9), %v717_v1  ;;  %652 = vmatpush3.bf16.msra.mxu1 (!%p192_p9), %v722_v2  ;;  %v729_v13 = vld [vmem:[%s992_s3 + $0x38] sm:$0xff] (!%p192_p9)   ;;  %v595_v14 = vld [vmem:[%s991_s2] ss:$0 sm:$0xff] (!%p192_p9)  ;;  %s218_s26 = scalar_lea.vmem (!%p192_p9), [#allocation2], %s592_s17  ;;  %s942_s9 = scalar_lea.hbm (!%p192_p9), %s994_s5, %s620_s30 }
  0x11   : > { %653 = vmatprep.subr.bf16.mxu1 (!%p192_p9), %v723_v3  ;;  %v606_v43 = vld [vmem:[%s993_s4] ss:$0 sm:$0xff] (!%p192_p9)  ;;  %s526_s6 = sshll.u32 (!%p192_p9), %s218_s26, 4  ;;  %s948_s22 = scalar_lea.sflag (!%p192_p9), [#allocation3], %s216_s16  ;;  %s944_s6 = int_to_ptr.vmem [resolvable:$true] %s526_s6 }
  0x12   : > { %s746_s10 = scalar_lea.vmem (!%p192_p9), %s944_s6, 1024  ;;  %s810_s11 = smov (!%p192_p9), [#allocation2]  }
  0x13   : > { %642 = vmatpush3.bf16.msra.mxu0 (!%p192_p9), %v717_v1  ;;  %p747_p11 = scmp.ne.s32.totalorder (!%p192_p9), %s944_s6, %s746_s10  ;;  %s750_s12 = sshll.u32 (!%p192_p9), %s810_s11, 4  ;;  %s751_s12 = int_to_ptr.vmem [resolvable:$false] %s750_s12 }
  0x14   : > { %654 = vmatpush3.bf16.msra.mxu1 (!%p192_p9), %v723_v3  ;;  %s752_s13 = scalar_lea.vmem (!%p192_p9), %s751_s12, 2048  ;;  %p753_p0 = scmp.lt.s32.totalorder (!%p192_p9), %s944_s6, %s751_s12 }
  0x15   : > { %s1002_s7 = smov (!%p220_p10, %s593_s7), 63  ;;  %655 = vmatprep.subr.bf16.mxu1 %v724_v4  ;;  %p748_p12 = pnand %p747_p11, %p881_p5 }
  0x16   : > { %s594_s14 = sshll.u32 %s1002_s7, 2  ;;  %p754_p1 = scmp.lt.s32.totalorder %s752_s13, %s746_s10 }
  0x17   : > { %s223_s25 = scalar_lea.vmem %s989_s0, %s594_s14  ;;  %p749_p13 = pneg %p748_p12 }
  0x18   : > { %v718_v5 = vld [vmem:[%s223_s25] sm:$0xff]   ;;  %v719_v6 = vld [vmem:[%s223_s25 + $0x8] sm:$0xff]   ;;  %v720_v7 = vld [vmem:[%s223_s25 + $0x10] sm:$0xff]   ;;  %656 = vmatpush3.bf16.msra.mxu1 %v724_v4  ;;  %p755_p2 = por %p754_p1, %p753_p0 }
  0x19   : > { %643 = vmatprep.mubr.msk.bf16.mxu0 %vm278_vm0, %v718_v5  ;;  %v721_v8 = vld [vmem:[%s223_s25 + $0x18] sm:$0xff]   ;;  %657 = vmatprep.subr.bf16.mxu1 %v725_v9 }
  0x1a   : > { %644 = vmatmul.mubr.msk.bf16.vlgmr.msra.gmra.mrb[0].mxu0 %vm278_vm0, %v719_v6  ;;  %p756_p3 = pnand %p755_p2, %p749_p13 }
  0x1b   : > { %647 = vmatprep.mubr.msk.bf16.mxu0 %vm278_vm0, %v720_v7 }
  0x1c   : > { %658 = vmatpush3.bf16.msra.mxu1 %v725_v9 }
  0x1d   : > { %659 = vmatprep.subr.bf16.mxu1 %v726_v10 }
  0x20   : > { %660 = vmatpush3.bf16.msra.mxu1 %v726_v10 }
  0x21   : > { %661 = vmatprep.subr.bf16.mxu1 %v727_v11 }
  0x22   : > { %648 = vmatmul.mubr.msk.bf16.gmra.mrb[4].mxu0 %vm278_vm0, %v721_v8 }
  0x24   : > { %662 = vmatpush3.bf16.msra.mxu1 %v727_v11 }
  0x25   : > { %663 = vmatprep.subr.bf16.mxu1 %v728_v12 }
  0x28   : > { %664 = vmatpush3.bf16.msra.mxu1 %v728_v12 }
  0x29   : > { %665 = vmatprep.subr.bf16.mxu1 %v729_v13 }
  0x2c   : > { %666 = vmatpush3.bf16.msra.mxu1 %v729_v13 }
  0xed   : > { %v645_v15 = vpop.f32.mrb[0].mxu0 }
  0xee   : > { %v334_v16 = vadd.f32 %v645_v15, %v595_v14  ;;  %v325_v17 = vpop.f32.mrb[1].mxu0 }
  0xef   : > { %v326_v18 = vadd.f32 %v595_v14, %v325_v17  ;;  %v646_v19 = vpop.f32.mrb[2].mxu0 }
  0xf0   : > { %730 = vtanh.f32 %v334_v16  ;;  %v337_v20 = vadd.f32 %v646_v19, %v595_v14  ;;  %v328_v21 = vpop.f32.mrb[3].mxu0 }
  0xf1   : > { %732 = vtanh.f32 %v326_v18  ;;  %v329_v22 = vadd.f32 %v595_v14, %v328_v21 }
  0xf2   : > { %734 = vtanh.f32 %v337_v20 }
  0xf3   : > { %736 = vtanh.f32 %v329_v22 }
  0xf5   : > { %v649_v23 = vpop.f32.mrb[4].mxu0 }
  0xf6   : > { %v350_v24 = vadd.f32 %v649_v23, %v595_v14  ;;  %v341_v25 = vpop.f32.mrb[5].mxu0 }
  0xf7   : > { %v342_v26 = vadd.f32 %v595_v14, %v341_v25  ;;  %v650_v27 = vpop.f32.mrb[6].mxu0 }
  0xf8   : > { %738 = vtanh.f32 %v350_v24  ;;  %v353_v28 = vadd.f32 %v650_v27, %v595_v14  ;;  %v344_v29 = vpop.f32.mrb[7].mxu0 }
  0xf9   : > { %740 = vtanh.f32 %v342_v26  ;;  %v345_v30 = vadd.f32 %v595_v14, %v344_v29 }
  0xfa   : > { %v731_v31 = vpop.eup %730  ;;  %742 = vtanh.f32 %v353_v28 }
  0xfb   : > { %v733_v32 = vpop.eup %732  ;;  %744 = vtanh.f32 %v345_v30 }
  0xfc   : > { %v735_v33 = vpop.eup %734 }
  0xfd   : > { %v737_v34 = vpop.eup %736  ;;  %v365_v35 = vpack.c.bf16 %v735_v33, %v731_v31 }
  0xfe   : > { %v364_v36 = vpack.c.bf16 %v737_v34, %v733_v32 }
 0x100   : > { %667 = vmatprep.mubr.bf16.mxu1 %v364_v36 }
 0x101   : > { %668 = vmatmul.mubr.bf16.vlgmr.msra.gmra.mrb[0].mxu1 %v365_v35 }
 0x102   : > { %v739_v37 = vpop.eup %738 }
 0x103   : > { %v741_v38 = vpop.eup %740 }
 0x104   : > { %v743_v39 = vpop.eup %742 }
 0x105   : > { %v745_v40 = vpop.eup %744  ;;  %v367_v41 = vpack.c.bf16 %v743_v39, %v739_v37 }
 0x106   : > { %v366_v42 = vpack.c.bf16 %v745_v40, %v741_v38 }
 0x108   : > { %671 = vmatprep.mubr.bf16.mxu1 %v366_v42 }
 0x109   : > { %672 = vmatmul.mubr.bf16.gmra.mrb[4].mxu1 %v367_v41 }
 0x1d4   : > { %v669_v44 = vpop.f32.mrb[0].mxu1 }
 0x1d5   : > { %v482_v45 = vadd.f32 %v669_v44, %v606_v43  ;;  %v473_v46 = vpop.f32.mrb[1].mxu1 }
 0x1d6   : > { %v474_v47 = vadd.f32 %v606_v43, %v473_v46  ;;  %v670_v48 = vpop.f32.mrb[2].mxu1 }
 0x1d7   : > { %506 = vst [vmem:[%s218_s26 + $0x10] sm:$0xff] %v482_v45  ;;  %v485_v49 = vadd.f32 %v670_v48, %v606_v43  ;;  %v476_v50 = vpop.f32.mrb[3].mxu1 }
 0x1d8   : > { %504 = vst [vmem:[%s218_s26] sm:$0xff] %v474_v47  ;;  %v477_v51 = vadd.f32 %v606_v43, %v476_v50 }
 0x1d9   : > { %507 = vst [vmem:[%s218_s26 + $0x18] sm:$0xff] %v485_v49 }
 0x1da   : > { %505 = vst [vmem:[%s218_s26 + $0x8] sm:$0xff] %v477_v51 }
 0x1dc   : > { %v673_v52 = vpop.f32.mrb[4].mxu1 }
 0x1dd   : > { %v498_v53 = vadd.f32 %v673_v52, %v606_v43  ;;  %v489_v54 = vpop.f32.mrb[5].mxu1 }
 0x1de   : > { %v490_v55 = vadd.f32 %v606_v43, %v489_v54  ;;  %v674_v56 = vpop.f32.mrb[6].mxu1 }
 0x1df   : > { %510 = vst [vmem:[%s218_s26 + $0x30] sm:$0xff] %v498_v53  ;;  %v501_v57 = vadd.f32 %v674_v56, %v606_v43  ;;  %v492_v58 = vpop.f32.mrb[7].mxu1 }
 0x1e0   : > { %508 = vst [vmem:[%s218_s26 + $0x20] sm:$0xff] %v490_v55  ;;  %v493_v59 = vadd.f32 %v606_v43, %v492_v58 }
 0x1e1   : > { %511 = vst [vmem:[%s218_s26 + $0x38] sm:$0xff] %v501_v57 }
 0x1e2   : > { %509 = vst [vmem:[%s218_s26 + $0x28] sm:$0xff] %v493_v59 }
 0x1e3   : > { %759 = shalt.err (!%p756_p3)
}
 0x1e4   : > { %s760_s14 = scalar_lea.hbm %s942_s9, 1024  ;;  %s764_s17 = scalar_lea.hbm %s994_s5, 8192 }
 0x1e5   : > { %p761_p4 = scmp.ne.s32.totalorder %s942_s9, %s760_s14  ;;  %p765_p9 = scmp.lt.u32.totalorder %s942_s9, %s994_s5 }
 0x1e6   : > { %p766_p10 = scmp.lt.u32.totalorder %s764_s17, %s760_s14  ;;  %p768_p12 = scmp.lt.u32.totalorder %s760_s14, %s942_s9 }
 0x1e7   : > { %p762_p7 = pnand %p761_p4, %p881_p5 }
 0x1e8   : > { %p767_p11 = por %p766_p10, %p765_p9 }
 0x1e9   : > { %p763_p8 = pneg %p762_p7 }
 0x1ea   : > { %p769_p13 = por %p768_p12, %p767_p11 }
 0x1ec   : > { %p770_p0 = pnand %p769_p13, %p763_p8 }
 0x1ee   : > { %773 = shalt.err (!%p770_p0)
}
 0x1ef   : > { %s811_s26 = smov 128   ;;  %s812_s30 = smov 8  }
 0x1f0   : > { %675 = dma.vmem_to_hbm [thread:$0]  (%p881_p5), %s944_s6, 1024, %s942_s9, %s948_s22, %s811_s26, %s811_s26, %s812_s30  }
 0x1f1 PF: > { %p681_p1 = scmp.ge.s32.totalorder %s808_s21, 2  ;;  %s541_s7 = sand.u32 1, %s796_s18  }
 0x1f2   : > { %s542_s8 = scalar_lea.sflag [#allocation3], %s541_s7 }
 0x1f3   : > { %p678_p2 = pnand %p681_p1, %p885_p6 }
 0x1f5   : > { %791 = dma.done.wait (!%p678_p2), %s542_s8, 1024  }
 0x1f6   : > { %793 = vsyncadd (!%p678_p2), %s542_s8, 4294966272  ;;  %p15_p3 = scmp.ge.s32.totalorder %s868_s24, 10   ;;  %s997_s18 = smov %s800_s19 }
 0x1f7   : > { %s998_s19 = smov %s804_s20  ;;  %s999_s20 = smov %s879_s27 }
 0x1f8   : > { %s1000_s21 = smov %s868_s24  ;;  %17 = sbr.rel (!%p15_p3) target bundleno = 3 (0x3), region = 75 }
 0x1ff   :  { %547 = vsyncpa [#allocation3], 1 }
 0x200   :  { %549 = vsyncpa [#allocation3 + $0x1], 1 }

</bundles_post_ra>
